<compile_context>
chip_gen: v5e
topology: v5e:2x2
jax: 0.10.0
libtpu: 0.0.40
codegen_flags: <defaults>
</compile_context>

<pallas_src>
import functools

import jax
import jax.numpy as jnp
from jax import lax
from jax.experimental import pallas as pl
from jax.experimental.pallas import tpu as pltpu


def dgm_kernel(txT_ref,
               w0u_ref, b0_ref,
               wzgr_ref, bzgr_ref,
               wh_ref, bh_ref,
               w1_ref, b1_ref,
               out_ref,
               u_zgr_s, u_h_s,
               *, L, M):
    f32 = jnp.float32
    txT = txT_ref[...]                                           # (2, TN)

    # One fused input projection  [W0; Uz; Ug; Ur; Uh] @ txT -> (5M, TN).
    proj = jnp.dot(w0u_ref[...], txT, preferred_element_type=f32)

    # Initial state S = tanh(W0 tx + b0), batch on the lane axis.
    S = jnp.tanh(proj[:M, :] + b0_ref[...])                      # (M, TN)

    # tx-only projections are loop invariant: fold their recurrent biases in
    # once and park the result in VMEM scratch so it neither occupies vregs
    # across the unrolled recurrence nor re-emits the bias broadcast L times.
    u_zgr_s[...] = proj[M:4 * M, :] + bzgr_ref[...]              # (3M, TN)
    u_h_s[...] = proj[4 * M:, :] + bh_ref[...]                   # (M,  TN)

    def step(_, S):
        # One matmul + ONE 128-lane-dense tanh covers the Z, G, R gates.
        zgr = jnp.tanh(u_zgr_s[...]
                       + jnp.dot(wzgr_ref[...], S,
                                 preferred_element_type=f32))    # (3M, TN)
        Z = zgr[:M, :]
        G = zgr[M:2 * M, :]
        R = zgr[2 * M:, :]
        H = jnp.tanh(u_h_s[...]
                     + jnp.dot(wh_ref[...], S * R,
                               preferred_element_type=f32))      # (M, TN)
        return (1.0 - G) * H + Z * S

    S = lax.fori_loop(0, L, step, S, unroll=True)

    # Lane-dense (1, TN) output row (full unmasked vst): out = W1 @ S + b1.
    out_ref[...] = (jnp.dot(w1_ref[...], S, preferred_element_type=f32)
                    + b1_ref[0, 0])


def dgm_forward(t, x, params, *, L=3, tile_n=128):
    """DGM forward pass. t, x: (N,) float32 -> returns (N,) float32.

    tile_n: batch points per grid step (lane axis). 128 keeps the grid at 2
    (even) blocks for the toy N=256 demo so both v7x TensorCores are fed; for
    large N on single-TC v5e/v6e raise to 512-1024 (VMEM footprint per tile is
    far below the scoped limit on every generation).
    """
    N = t.shape[0]
    M = params["w0"].shape[0]                                    # [out, in] layout

    # Batch on the LANE axis: tx is (2, N).
    txT = jnp.stack((t, x), axis=0).astype(jnp.float32)          # (2, N)

    # Handle ragged batches by zero-padding up to a tile multiple.
    pad = (-N) % tile_n
    if pad:
        txT = jnp.pad(txT, ((0, 0), (0, pad)))
    Np = N + pad
    n_tiles = Np // tile_n

    # Host-side packing into lane/sublane-dense slabs (PyTorch [out, in] layout
    # is kept as-is -> no transposes anywhere).
    w0u = jnp.concatenate([params["w0"], params["uz"], params["ug"],
                           params["ur"], params["uh"]], axis=0)          # (5M, 2)
    wzgr = jnp.concatenate([params["wz"], params["wg"], params["wr"]],
                           axis=0)                                       # (3M, M)
    b0c = params["b0"].reshape(M, 1)
    bzgrc = jnp.concatenate([params["bz"], params["bg"],
                             params["br"]]).reshape(3 * M, 1)            # (3M, 1)
    bhc = params["bh"].reshape(M, 1)
    b1c = params["b1"].reshape(1, 1)

    full = lambda shape: pl.BlockSpec(shape, lambda i: (0, 0))

    out = pl.pallas_call(
        functools.partial(dgm_kernel, L=L, M=M),
        out_shape=jax.ShapeDtypeStruct((1, Np), jnp.float32),
        grid_spec=pltpu.PrefetchScalarGridSpec(
            num_scalar_prefetch=0,
            grid=(n_tiles,),
            in_specs=[
                pl.BlockSpec((2, tile_n), lambda i: (0, i)),     # txT tile
                full((5 * M, 2)), full((M, 1)),                  # [W0;Uz;Ug;Ur;Uh], b0
                full((3 * M, M)), full((3 * M, 1)),              # [Wz;Wg;Wr], [bz;bg;br]
                full((M, M)), full((M, 1)),                      # Wh, bh
                full((1, M)),                                    # W1 (1, M)
                pl.BlockSpec(memory_space=pltpu.MemorySpace.SMEM),  # b1 scalar
            ],
            out_specs=pl.BlockSpec((1, tile_n), lambda i: (0, i)),
            scratch_shapes=[
                pltpu.VMEM((3 * M, tile_n), jnp.float32),        # [Uz;Ug;Ur] tx + b
                pltpu.VMEM((M, tile_n), jnp.float32),            # Uh tx + bh
            ]),
        compiler_params=pltpu.CompilerParams(
            dimension_semantics=("parallel",)),
    )(
        txT,
        w0u, b0c,
        wzgr, bzgrc,
        params["wh"], bhc,
        params["w1"], b1c,
    )
    return out.reshape(-1)[:N]


def init_params(key, d=1, M=32):
    """Deterministic init mimicking nn.Linear defaults (U(-1/sqrt(fan_in), ...)).
    Weights are stored in PyTorch [out_features, in_features] layout."""
    Din = d + 1

    def linear(key, fan_in, fan_out, bias=True):
        kw, kb = jax.random.split(key)
        bound = 1.0 / jnp.sqrt(fan_in)
        w = jax.random.uniform(kw, (fan_out, fan_in), jnp.float32, -bound, bound)
        b = (jax.random.uniform(kb, (fan_out,), jnp.float32, -bound, bound)
             if bias else None)
        return w, b

    keys = jax.random.split(key, 10)
    p = {}
    p["w0"], p["b0"] = linear(keys[0], Din, M)
    p["w1"], p["b1"] = linear(keys[1], M, 1)
    p["uz"], _ = linear(keys[2], Din, M, bias=False)
    p["ug"], _ = linear(keys[3], Din, M, bias=False)
    p["ur"], _ = linear(keys[4], Din, M, bias=False)
    p["uh"], _ = linear(keys[5], Din, M, bias=False)
    p["wz"], p["bz"] = linear(keys[6], M, M)
    p["wg"], p["bg"] = linear(keys[7], M, M)
    p["wr"], p["br"] = linear(keys[8], M, M)
    p["wh"], p["bh"] = linear(keys[9], M, M)
    return p


def dgm_reference(t, x, params, *, L=3):
    """Pure-JAX reference (mirrors the PyTorch forward exactly)."""
    tx = jnp.stack((t, x), axis=-1)
    S = jnp.tanh(tx @ params["w0"].T + params["b0"])
    for _ in range(L):
        Z = jnp.tanh(tx @ params["uz"].T + S @ params["wz"].T + params["bz"])
        G = jnp.tanh(tx @ params["ug"].T + S @ params["wg"].T + params["bg"])
        R = jnp.tanh(tx @ params["ur"].T + S @ params["wr"].T + params["br"])
        H = jnp.tanh(tx @ params["uh"].T + (S * R) @ params["wh"].T + params["bh"])
        S = (1.0 - G) * H + Z * S
    return (S @ params["w1"].T + params["b1"]).reshape(-1)


if __name__ == "__main__":
    d, M, L = 1, 32, 3
    N = 256  # batch of collocation points -> grid = (2,), feeds both v7x TCs

    key = jax.random.PRNGKey(0)
    kp, kt, kx = jax.random.split(key, 3)
    params = init_params(kp, d=d, M=M)
    t = jax.random.uniform(kt, (N,), jnp.float32)
    x = jax.random.normal(kx, (N,), jnp.float32)

    out = dgm_forward(t, x, params, L=L, tile_n=128)
    out = jax.block_until_ready(out)

    ref = dgm_reference(t, x, params, L=L)
    assert out.shape == (N,)
    assert jnp.allclose(out, ref, atol=3e-5, rtol=3e-5), "mismatch vs reference"

    print("KERNEL_OK")
</pallas_src>

<mosaic_0001>
module attributes {stable_mosaic.version = 11 : i64} {
  func.func @dgm_kernel(%arg0: i32, %arg1: memref<2x128xf32, #tpu.memory_space<vmem>>, %arg2: memref<160x2xf32, #tpu.memory_space<vmem>>, %arg3: memref<32x1xf32, #tpu.memory_space<vmem>>, %arg4: memref<96x32xf32, #tpu.memory_space<vmem>>, %arg5: memref<96x1xf32, #tpu.memory_space<vmem>>, %arg6: memref<32x32xf32, #tpu.memory_space<vmem>>, %arg7: memref<32x1xf32, #tpu.memory_space<vmem>>, %arg8: memref<1x32xf32, #tpu.memory_space<vmem>>, %arg9: memref<1x1xf32, #tpu.memory_space<smem>>, %arg10: memref<1x128xf32, #tpu.memory_space<vmem>>, %arg11: memref<96x128xf32, #tpu.memory_space<vmem>>, %arg12: memref<32x128xf32, #tpu.memory_space<vmem>>) attributes {dimension_semantics = [#tpu.dimension_semantics<parallel>], iteration_bounds = array<i64: 2>, scalar_prefetch = 0 : i64, scratch_operands = 2 : i64, tpu.core_type = #tpu.core_type<tc>, window_params = [{transform_indices = @transform_0, window_bounds = array<i64: 2, 128>}, {pipeline_mode = #tpu.pipeline_mode<synchronous>, transform_indices = @transform_1, window_bounds = array<i64: 160, 2>}, {pipeline_mode = #tpu.pipeline_mode<synchronous>, transform_indices = @transform_2, window_bounds = array<i64: 32, 1>}, {pipeline_mode = #tpu.pipeline_mode<synchronous>, transform_indices = @transform_3, window_bounds = array<i64: 96, 32>}, {pipeline_mode = #tpu.pipeline_mode<synchronous>, transform_indices = @transform_4, window_bounds = array<i64: 96, 1>}, {pipeline_mode = #tpu.pipeline_mode<synchronous>, transform_indices = @transform_5, window_bounds = array<i64: 32, 32>}, {pipeline_mode = #tpu.pipeline_mode<synchronous>, transform_indices = @transform_6, window_bounds = array<i64: 32, 1>}, {pipeline_mode = #tpu.pipeline_mode<synchronous>, transform_indices = @transform_7, window_bounds = array<i64: 1, 32>}, {transform_indices = @transform_8, window_bounds = array<i64: 1, 1>}, {transform_indices = @transform_9, window_bounds = array<i64: 1, 128>}]} {
    %c0 = arith.constant 0 : index
    %c0_0 = arith.constant 0 : index
    %0 = vector.load %arg1[%c0, %c0_0] : memref<2x128xf32, #tpu.memory_space<vmem>>, vector<2x128xf32>
    %c0_1 = arith.constant 0 : index
    %c0_2 = arith.constant 0 : index
    %1 = vector.load %arg2[%c0_1, %c0_2] : memref<160x2xf32, #tpu.memory_space<vmem>>, vector<160x2xf32>
    %cst = arith.constant dense<0.000000e+00> : vector<160x128xf32>
    %2 = tpu.matmul %1, %0, %cst {dimension_numbers = #tpu.dot_dimension_numbers<[1], [0], [0], [1], [0, 0, 1, 1], [], []>} : vector<160x2xf32>, vector<2x128xf32>, vector<160x128xf32> -> vector<160x128xf32>
    %3 = vector.extract_strided_slice %2 {offsets = [0, 0], sizes = [32, 128], strides = [1, 1]} : vector<160x128xf32> to vector<32x128xf32>
    %c0_3 = arith.constant 0 : index
    %c0_4 = arith.constant 0 : index
    %4 = vector.load %arg3[%c0_3, %c0_4] : memref<32x1xf32, #tpu.memory_space<vmem>>, vector<32x1xf32>
    %5 = vector.broadcast %4 : vector<32x1xf32> to vector<32x128xf32>
    %6 = arith.addf %3, %5 : vector<32x128xf32>
    %7 = math.tanh %6 : vector<32x128xf32>
    %8 = vector.extract_strided_slice %2 {offsets = [32, 0], sizes = [96, 128], strides = [1, 1]} : vector<160x128xf32> to vector<96x128xf32>
    %c0_5 = arith.constant 0 : index
    %c0_6 = arith.constant 0 : index
    %9 = vector.load %arg5[%c0_5, %c0_6] : memref<96x1xf32, #tpu.memory_space<vmem>>, vector<96x1xf32>
    %10 = vector.broadcast %9 : vector<96x1xf32> to vector<96x128xf32>
    %11 = arith.addf %8, %10 : vector<96x128xf32>
    %c0_7 = arith.constant 0 : index
    %c0_8 = arith.constant 0 : index
    %12 = vector.load %arg11[%c0_7, %c0_8] : memref<96x128xf32, #tpu.memory_space<vmem>>, vector<96x128xf32>
    tpu.vector_store %arg11[%c0_7, %c0_8], %11 {strides = array<i32>} : memref<96x128xf32, #tpu.memory_space<vmem>>, vector<96x128xf32>,
    %13 = vector.extract_strided_slice %2 {offsets = [128, 0], sizes = [32, 128], strides = [1, 1]} : vector<160x128xf32> to vector<32x128xf32>
    %c0_9 = arith.constant 0 : index
    %c0_10 = arith.constant 0 : index
    %14 = vector.load %arg7[%c0_9, %c0_10] : memref<32x1xf32, #tpu.memory_space<vmem>>, vector<32x1xf32>
    %15 = vector.broadcast %14 : vector<32x1xf32> to vector<32x128xf32>
    %16 = arith.addf %13, %15 : vector<32x128xf32>
    %c0_11 = arith.constant 0 : index
    %c0_12 = arith.constant 0 : index
    %17 = vector.load %arg12[%c0_11, %c0_12] : memref<32x128xf32, #tpu.memory_space<vmem>>, vector<32x128xf32>
    tpu.vector_store %arg12[%c0_11, %c0_12], %16 {strides = array<i32>} : memref<32x128xf32, #tpu.memory_space<vmem>>, vector<32x128xf32>,
    %c0_i32 = arith.constant 0 : i32
    %c0_13 = arith.constant 0 : index
    %c0_14 = arith.constant 0 : index
    %18 = vector.load %arg11[%c0_13, %c0_14] : memref<96x128xf32, #tpu.memory_space<vmem>>, vector<96x128xf32>
    %c0_15 = arith.constant 0 : index
    %c0_16 = arith.constant 0 : index
    %19 = vector.load %arg4[%c0_15, %c0_16] : memref<96x32xf32, #tpu.memory_space<vmem>>, vector<96x32xf32>
    %cst_17 = arith.constant dense<0.000000e+00> : vector<96x128xf32>
    %20 = tpu.matmul %19, %7, %cst_17 {dimension_numbers = #tpu.dot_dimension_numbers<[1], [0], [0], [1], [0, 0, 1, 1], [], []>} : vector<96x32xf32>, vector<32x128xf32>, vector<96x128xf32> -> vector<96x128xf32>
    %21 = arith.addf %18, %20 : vector<96x128xf32>
    %22 = math.tanh %21 : vector<96x128xf32>
    %23 = vector.extract_strided_slice %22 {offsets = [0, 0], sizes = [32, 128], strides = [1, 1]} : vector<96x128xf32> to vector<32x128xf32>
    %24 = vector.extract_strided_slice %22 {offsets = [32, 0], sizes = [32, 128], strides = [1, 1]} : vector<96x128xf32> to vector<32x128xf32>
    %25 = vector.extract_strided_slice %22 {offsets = [64, 0], sizes = [32, 128], strides = [1, 1]} : vector<96x128xf32> to vector<32x128xf32>
    %c0_18 = arith.constant 0 : index
    %c0_19 = arith.constant 0 : index
    %26 = vector.load %arg12[%c0_18, %c0_19] : memref<32x128xf32, #tpu.memory_space<vmem>>, vector<32x128xf32>
    %c0_20 = arith.constant 0 : index
    %c0_21 = arith.constant 0 : index
    %27 = vector.load %arg6[%c0_20, %c0_21] : memref<32x32xf32, #tpu.memory_space<vmem>>, vector<32x32xf32>
    %28 = arith.mulf %7, %25 : vector<32x128xf32>
    %cst_22 = arith.constant dense<0.000000e+00> : vector<32x128xf32>
    %29 = tpu.matmul %27, %28, %cst_22 {dimension_numbers = #tpu.dot_dimension_numbers<[1], [0], [0], [1], [0, 0, 1, 1], [], []>} : vector<32x32xf32>, vector<32x128xf32>, vector<32x128xf32> -> vector<32x128xf32>
    %30 = arith.addf %26, %29 : vector<32x128xf32>
    %31 = math.tanh %30 : vector<32x128xf32>
    %cst_23 = arith.constant 1.000000e+00 : f32
    %32 = vector.broadcast %cst_23 : f32 to vector<32x128xf32>
    %33 = arith.subf %32, %24 : vector<32x128xf32>
    %34 = arith.mulf %33, %31 : vector<32x128xf32>
    %35 = arith.mulf %23, %7 : vector<32x128xf32>
    %36 = arith.addf %34, %35 : vector<32x128xf32>
    %c1_i32 = arith.constant 1 : i32
    %c0_24 = arith.constant 0 : index
    %c0_25 = arith.constant 0 : index
    %37 = vector.load %arg11[%c0_24, %c0_25] : memref<96x128xf32, #tpu.memory_space<vmem>>, vector<96x128xf32>
    %c0_26 = arith.constant 0 : index
    %c0_27 = arith.constant 0 : index
    %38 = vector.load %arg4[%c0_26, %c0_27] : memref<96x32xf32, #tpu.memory_space<vmem>>, vector<96x32xf32>
    %cst_28 = arith.constant dense<0.000000e+00> : vector<96x128xf32>
    %39 = tpu.matmul %38, %36, %cst_28 {dimension_numbers = #tpu.dot_dimension_numbers<[1], [0], [0], [1], [0, 0, 1, 1], [], []>} : vector<96x32xf32>, vector<32x128xf32>, vector<96x128xf32> -> vector<96x128xf32>
    %40 = arith.addf %37, %39 : vector<96x128xf32>
    %41 = math.tanh %40 : vector<96x128xf32>
    %42 = vector.extract_strided_slice %41 {offsets = [0, 0], sizes = [32, 128], strides = [1, 1]} : vector<96x128xf32> to vector<32x128xf32>
    %43 = vector.extract_strided_slice %41 {offsets = [32, 0], sizes = [32, 128], strides = [1, 1]} : vector<96x128xf32> to vector<32x128xf32>
    %44 = vector.extract_strided_slice %41 {offsets = [64, 0], sizes = [32, 128], strides = [1, 1]} : vector<96x128xf32> to vector<32x128xf32>
    %c0_29 = arith.constant 0 : index
    %c0_30 = arith.constant 0 : index
    %45 = vector.load %arg12[%c0_29, %c0_30] : memref<32x128xf32, #tpu.memory_space<vmem>>, vector<32x128xf32>
    %c0_31 = arith.constant 0 : index
    %c0_32 = arith.constant 0 : index
    %46 = vector.load %arg6[%c0_31, %c0_32] : memref<32x32xf32, #tpu.memory_space<vmem>>, vector<32x32xf32>
    %47 = arith.mulf %36, %44 : vector<32x128xf32>
    %cst_33 = arith.constant dense<0.000000e+00> : vector<32x128xf32>
    %48 = tpu.matmul %46, %47, %cst_33 {dimension_numbers = #tpu.dot_dimension_numbers<[1], [0], [0], [1], [0, 0, 1, 1], [], []>} : vector<32x32xf32>, vector<32x128xf32>, vector<32x128xf32> -> vector<32x128xf32>
    %49 = arith.addf %45, %48 : vector<32x128xf32>
    %50 = math.tanh %49 : vector<32x128xf32>
    %cst_34 = arith.constant 1.000000e+00 : f32
    %51 = vector.broadcast %cst_34 : f32 to vector<32x128xf32>
    %52 = arith.subf %51, %43 : vector<32x128xf32>
    %53 = arith.mulf %52, %50 : vector<32x128xf32>
    %54 = arith.mulf %42, %36 : vector<32x128xf32>
    %55 = arith.addf %53, %54 : vector<32x128xf32>
    %c2_i32 = arith.constant 2 : i32
    %c0_35 = arith.constant 0 : index
    %c0_36 = arith.constant 0 : index
    %56 = vector.load %arg11[%c0_35, %c0_36] : memref<96x128xf32, #tpu.memory_space<vmem>>, vector<96x128xf32>
    %c0_37 = arith.constant 0 : index
    %c0_38 = arith.constant 0 : index
    %57 = vector.load %arg4[%c0_37, %c0_38] : memref<96x32xf32, #tpu.memory_space<vmem>>, vector<96x32xf32>
    %cst_39 = arith.constant dense<0.000000e+00> : vector<96x128xf32>
    %58 = tpu.matmul %57, %55, %cst_39 {dimension_numbers = #tpu.dot_dimension_numbers<[1], [0], [0], [1], [0, 0, 1, 1], [], []>} : vector<96x32xf32>, vector<32x128xf32>, vector<96x128xf32> -> vector<96x128xf32>
    %59 = arith.addf %56, %58 : vector<96x128xf32>
    %60 = math.tanh %59 : vector<96x128xf32>
    %61 = vector.extract_strided_slice %60 {offsets = [0, 0], sizes = [32, 128], strides = [1, 1]} : vector<96x128xf32> to vector<32x128xf32>
    %62 = vector.extract_strided_slice %60 {offsets = [32, 0], sizes = [32, 128], strides = [1, 1]} : vector<96x128xf32> to vector<32x128xf32>
    %63 = vector.extract_strided_slice %60 {offsets = [64, 0], sizes = [32, 128], strides = [1, 1]} : vector<96x128xf32> to vector<32x128xf32>
    %c0_40 = arith.constant 0 : index
    %c0_41 = arith.constant 0 : index
    %64 = vector.load %arg12[%c0_40, %c0_41] : memref<32x128xf32, #tpu.memory_space<vmem>>, vector<32x128xf32>
    %c0_42 = arith.constant 0 : index
    %c0_43 = arith.constant 0 : index
    %65 = vector.load %arg6[%c0_42, %c0_43] : memref<32x32xf32, #tpu.memory_space<vmem>>, vector<32x32xf32>
    %66 = arith.mulf %55, %63 : vector<32x128xf32>
    %cst_44 = arith.constant dense<0.000000e+00> : vector<32x128xf32>
    %67 = tpu.matmul %65, %66, %cst_44 {dimension_numbers = #tpu.dot_dimension_numbers<[1], [0], [0], [1], [0, 0, 1, 1], [], []>} : vector<32x32xf32>, vector<32x128xf32>, vector<32x128xf32> -> vector<32x128xf32>
    %68 = arith.addf %64, %67 : vector<32x128xf32>
    %69 = math.tanh %68 : vector<32x128xf32>
    %cst_45 = arith.constant 1.000000e+00 : f32
    %70 = vector.broadcast %cst_45 : f32 to vector<32x128xf32>
    %71 = arith.subf %70, %62 : vector<32x128xf32>
    %72 = arith.mulf %71, %69 : vector<32x128xf32>
    %73 = arith.mulf %61, %55 : vector<32x128xf32>
    %74 = arith.addf %72, %73 : vector<32x128xf32>
    %c0_46 = arith.constant 0 : index
    %c0_47 = arith.constant 0 : index
    %75 = vector.load %arg8[%c0_46, %c0_47] : memref<1x32xf32, #tpu.memory_space<vmem>>, vector<1x32xf32>
    %cst_48 = arith.constant dense<0.000000e+00> : vector<1x128xf32>
    %76 = tpu.matmul %75, %74, %cst_48 {dimension_numbers = #tpu.dot_dimension_numbers<[1], [0], [0], [1], [0, 0, 1, 1], [], []>} : vector<1x32xf32>, vector<32x128xf32>, vector<1x128xf32> -> vector<1x128xf32>
    %c0_49 = arith.constant 0 : index
    %c0_50 = arith.constant 0 : index
    %77 = memref.load %arg9[%c0_49, %c0_50] : memref<1x1xf32, #tpu.memory_space<smem>>
    %78 = vector.broadcast %77 : f32 to vector<1x128xf32>
    %79 = arith.addf %76, %78 : vector<1x128xf32>
    %c0_51 = arith.constant 0 : index
    %c0_52 = arith.constant 0 : index
    %80 = vector.load %arg10[%c0_51, %c0_52] : memref<1x128xf32, #tpu.memory_space<vmem>>, vector<1x128xf32>
    tpu.vector_store %arg10[%c0_51, %c0_52], %79 {strides = array<i32>} : memref<1x128xf32, #tpu.memory_space<vmem>>, vector<1x128xf32>,
    return
  }
  func.func @transform_0(%arg0: i32) -> (i32, i32) {
    %c0_i32 = arith.constant 0 : i32
    %c0_i32_0 = arith.constant 0 : i32
    return %c0_i32, %arg0 : i32, i32
  }
  func.func @transform_1(%arg0: i32) -> (i32, i32) {
    %c0_i32 = arith.constant 0 : i32
    %c0_i32_0 = arith.constant 0 : i32
    %c0_i32_1 = arith.constant 0 : i32
    return %c0_i32, %c0_i32_0 : i32, i32
  }
  func.func @transform_2(%arg0: i32) -> (i32, i32) {
    %c0_i32 = arith.constant 0 : i32
    %c0_i32_0 = arith.constant 0 : i32
    %c0_i32_1 = arith.constant 0 : i32
    return %c0_i32, %c0_i32_0 : i32, i32
  }
  func.func @transform_3(%arg0: i32) -> (i32, i32) {
    %c0_i32 = arith.constant 0 : i32
    %c0_i32_0 = arith.constant 0 : i32
    %c0_i32_1 = arith.constant 0 : i32
    return %c0_i32, %c0_i32_0 : i32, i32
  }
  func.func @transform_4(%arg0: i32) -> (i32, i32) {
    %c0_i32 = arith.constant 0 : i32
    %c0_i32_0 = arith.constant 0 : i32
    %c0_i32_1 = arith.constant 0 : i32
    return %c0_i32, %c0_i32_0 : i32, i32
  }
  func.func @transform_5(%arg0: i32) -> (i32, i32) {
    %c0_i32 = arith.constant 0 : i32
    %c0_i32_0 = arith.constant 0 : i32
    %c0_i32_1 = arith.constant 0 : i32
    return %c0_i32, %c0_i32_0 : i32, i32
  }
  func.func @transform_6(%arg0: i32) -> (i32, i32) {
    %c0_i32 = arith.constant 0 : i32
    %c0_i32_0 = arith.constant 0 : i32
    %c0_i32_1 = arith.constant 0 : i32
    return %c0_i32, %c0_i32_0 : i32, i32
  }
  func.func @transform_7(%arg0: i32) -> (i32, i32) {
    %c0_i32 = arith.constant 0 : i32
    %c0_i32_0 = arith.constant 0 : i32
    %c0_i32_1 = arith.constant 0 : i32
    return %c0_i32, %c0_i32_0 : i32, i32
  }
  func.func @transform_8(%arg0: i32) -> (i32, i32) {
    %c0_i32 = arith.constant 0 : i32
    %c0_i32_0 = arith.constant 0 : i32
    %c0_i32_1 = arith.constant 0 : i32
    return %c0_i32, %c0_i32_0 : i32, i32
  }
  func.func @transform_9(%arg0: i32) -> (i32, i32) {
    %c0_i32 = arith.constant 0 : i32
    %c0_i32_0 = arith.constant 0 : i32
    return %c0_i32, %arg0 : i32, i32
  }
}

</mosaic_0001>

<bundles_post_ra>
// kernel: tpu_custom_call.1
= control target key start
LH: loop header
LB: loop body
LE: loop exit
PB: predicated region body
PF: predicated region fallthrough
CT: control target
= control target key end

     0   :  { %s2174_s0 = inlined_call_operand.vmem [shape: f32[2,256], index: 0, kind: input, shape index: {}]   ;;  %s2175_s1 = inlined_call_operand.vmem [shape: f32[160,2], index: 1, kind: input, shape index: {}]   ;;  %s2176_s2 = inlined_call_operand.vmem [shape: f32[32,1], index: 2, kind: input, shape index: {}]   ;;  %s2177_s3 = inlined_call_operand.vmem [shape: f32[96,32], index: 3, kind: input, shape index: {}]   ;;  %s2178_s4 = inlined_call_operand.vmem [shape: f32[96,1], index: 4, kind: input, shape index: {}]   ;;  %s2179_s5 = inlined_call_operand.vmem [shape: f32[32,32], index: 5, kind: input, shape index: {}]   ;;  %s2180_s6 = inlined_call_operand.vmem [shape: f32[32,1], index: 6, kind: input, shape index: {}]   ;;  %s2181_s7 = inlined_call_operand.vmem [shape: f32[1,32], index: 7, kind: input, shape index: {}]   ;;  %s2182_s8 = inlined_call_operand.<no memory space> [shape: f32[1,1], index: 8, kind: input, shape index: {}]   ;;  %s2183_s9 = inlined_call_operand.hbm [shape: f32[1,256], index: 9, kind: output, shape index: {}]  }
   0x1   :  { %14 = sst [smem:[#allocation4]] %s2182_s8 }
   0x2   :  { %15 = vsyncpa [#allocation6], 0 }
   0x3   :  { %17 = vsyncpa [#allocation6 + $0x1], 0  ;;  %s1572_s11 = smov 0   ;;  %s1574_s12 = smov 0  }
   0x4   :  { %s1576_s13 = smov 0   ;;  %s1578_s14 = smov 0  }
   0x5 LB: > { %s1593_s8 = sadd.s32 4294967295, %s1516_s14   ;;  %s1229_s15 = sadd.s32 4294967294, %s1516_s14   ;;  %s1516_s14 = sphi %s1578_s14, %s2189_s14   ;;  %s1512_s13 = sphi %s1576_s13, %s2188_s13   ;;  %s1508_s12 = sphi %s1574_s12, %s2187_s12   ;;  %s1504_s11 = sphi %s1572_s11, %s2186_s11  }
   0x6   : > { %s1597_s16 = sadd.s32 1, %s1516_s14   ;;  %s224_s17 = sadd.s32 1, %s1512_s13 }
   0x7   : > { %s221_s18 = ssub.s32 %s1516_s14, %s1597_s16  ;;  %p234_p0 = scmp.ne.s32.totalorder %s1512_s13, %s1508_s12 }
   0x8   : > { %p222_p1 = scmp.eq.s32.totalorder %s221_s18, 0  ;;  %p235_p2 = scmp.eq.s32.totalorder %s1593_s8, 1 }
   0x9   : > { %p240_p3 = scmp.ne.s32.totalorder %s1508_s12, %s1504_s11  ;;  %p241_p4 = scmp.eq.s32.totalorder %s1229_s15, 1 }
   0xa   : > { %s1608_s19 = scalar_select %p222_p1, %s1512_s13, %s224_s17  }
   0xb   : > { %p1610_p5 = por %p235_p2, %p234_p0  ;;  %p1614_p6 = por %p241_p4, %p240_p3 }
   0xc   : > { %p1232_p7 = scmp.ge.s32.totalorder %s1516_s14, 1  ;;  %p290_p8 = scmp.lt.s32.totalorder %s1516_s14, 3 }
   0xe   : > { %p291_p9 = pnand %p1232_p7, %p290_p8 }
   0xf   : > { %p324_p10 = scmp.lt.s32.totalorder (!%p291_p9), %s1593_s8, 1  ;;  %s1135_s24 = sld [smem:[#allocation4]] (!%p291_p9) }
  0x10   : > { %294 = sbr.rel (%p291_p9) target bundleno = 1560 (0x618), region = 56  ;;  %s322_s25 = sand.u32 (!%p291_p9), 1, %s1508_s12  }
  0x11   : > { %s1170_s28 = scalar_lea.hbm (!%p291_p9), %s2183_s9, %s1593_s8  ;;  %s323_s29 = scalar_lea.vmem (!%p291_p9), [#allocation5], %s322_s25 }
  0x12   : > { %s1174_s10 = sshll.u32 (!%p291_p9), %s1170_s28, 4  ;;  %s1162_s15 = scalar_lea.sflag (!%p291_p9), [#allocation6], %s322_s25  ;;  %s1175_s10 = int_to_ptr.hbm [resolvable:$true] %s1174_s10 }
  0x13   : > { %s1468_s17 = sshra.s32 (!%p291_p9), %s1175_s10, 4  ;;  %s1469_s17 = int_to_ptr.hbm [resolvable:$true] %s1468_s17 }
  0x14   : > { %s1470_s18 = scalar_lea.hbm (!%p291_p9), %s1469_s17, 1  ;;  %p1475_p0 = scmp.lt.s32.totalorder (!%p291_p9), %s1469_s17, %s2183_s9 }
  0x15   : > { %v494_v0 = vld [vmem:[%s2176_s2 + $0x18] sm:$0xff]  ;;  %v492_v1 = vld [vmem:[%s2176_s2 + $0x8] sm:$0xff]  ;;  %v1518_v2 = vmov 0   ;;  %s325_s26 = scalar_select %p324_p10, %s1593_s8, 1  ;;  %vm410_vm0 = vcmask 1041408   ;;  %v329_v3 = vld [vmem:[%s2175_s1] sm:$0xff] }
  0x16   : > { %1348 = vset.pattern.permute.xlu1 %v1518_v2  ;;  %1347 = vset.pattern.permute.xlu0 %v1518_v2  ;;  %vm349_vm1 = vcmask 15360   ;;  %v493_v5 = vld [vmem:[%s2176_s2 + $0x10] sm:$0xff]  ;;  %v491_v6 = vld [vmem:[%s2176_s2] sm:$0xff]  ;;  %v330_v7 = vld [vmem:[%s2175_s1 + $0x8] sm:$0xff]  ;;  %vm675_vm2 = vcmask 261120   ;;  %p1471_p11 = scmp.ne.s32.totalorder %s1469_s17, %s1470_s18  ;;  %s1474_s8 = scalar_lea.hbm %s2183_s9, 2 }
  0x17   : > { %512 = vperm.xlu0 %1347, %v494_v0   ;;  %502 = vperm.xlu1 %1348, %v492_v1   ;;  %s1233_s27 = sshll.u32 %s325_s26, 1  ;;  %v532_v8 = vld [vmem:[%s2178_s4 + $0x48] sm:$0xff]  ;;  %v531_v9 = vld [vmem:[%s2178_s4 + $0x40] sm:$0xff]  ;;  %v331_v10 = vld [vmem:[%s2175_s1 + $0x10] sm:$0xff]  ;;  %p1476_p1 = scmp.lt.s32.totalorder %s1474_s8, %s1470_s18 }
  0x18   : > { %1349 = vset.pattern.permute.xlu2 %v1518_v2  ;;  %s327_s30 = scalar_lea.vmem %s2174_s0, %s1233_s27  ;;  %v526_v11 = vld [vmem:[%s2178_s4 + $0x18] sm:$0xff]  ;;  %v529_v12 = vld [vmem:[%s2178_s4 + $0x30] sm:$0xff]  ;;  %v528_v15 = vld [vmem:[%s2178_s4 + $0x28] sm:$0xff]  ;;  %p1472_p12 = pnand %p1471_p11, %p1610_p5 }
  0x19   : > { %v328_v4 = vld [vmem:[%s327_s30] sm:$0x3]  ;;  %v332_v13 = vld [vmem:[%s2175_s1 + $0x18] sm:$0xff]  ;;  %v525_v14 = vld [vmem:[%s2178_s4 + $0x10] sm:$0xff]  ;;  %s1172_s30 = sshll.u32 %s323_s29, 4  ;;  %p1477_p2 = por %p1476_p1, %p1475_p0  ;;  %s1173_s30 = int_to_ptr.vmem [resolvable:$true] %s1172_s30 }
  0x1a   : > { %1234 = vmatpush.msk.msra.mxu0 %vm410_vm0, %v328_v4  ;;  %1306 = vmatpush.msk.msra.mxu1 %vm410_vm0, %v328_v4  ;;  %v333_v16 = vld [vmem:[%s2175_s1 + $0x20] sm:$0xff]  ;;  %v524_v17 = vld [vmem:[%s2178_s4 + $0x8] sm:$0xff]  ;;  %v335_v22 = vld [vmem:[%s2175_s1 + $0x30] sm:$0xff]  ;;  %p1473_p13 = pneg %p1472_p12 }
  0x1b   : > { %1235 = vmatmul.msk.f32.vlgmr.msra.gmra.mxu0 %vm349_vm1, %v329_v3  ;;  %v527_v18 = vld [vmem:[%s2178_s4 + $0x20] sm:$0xff]  ;;  %v334_v19 = vld [vmem:[%s2175_s1 + $0x28] sm:$0xff]  ;;  %v336_v23 = vld [vmem:[%s2175_s1 + $0x38] sm:$0xff] }
  0x1c   : > { %v523_v20 = vld [vmem:[%s2178_s4] sm:$0xff]  ;;  %v338_v25 = vld [vmem:[%s2175_s1 + $0x48] sm:$0xff]  ;;  %v339_v26 = vld [vmem:[%s2175_s1 + $0x50] sm:$0xff]  ;;  %p1478_p3 = pnand %p1477_p2, %p1473_p13 }
  0x1d   : > { %v619_v21 = vld [vmem:[%s2180_s6] sm:$0xff]  ;;  %v340_v27 = vld [vmem:[%s2175_s1 + $0x58] sm:$0xff]  ;;  %v342_v29 = vld [vmem:[%s2175_s1 + $0x68] sm:$0xff] }
  0x1e   : > { %v337_v24 = vld [vmem:[%s2175_s1 + $0x40] sm:$0xff]  ;;  %v343_v30 = vld [vmem:[%s2175_s1 + $0x70] sm:$0xff]  ;;  %v344_v31 = vld [vmem:[%s2175_s1 + $0x78] sm:$0xff] }
  0x1f   : > { %507 = vperm.xlu0 %1347, %v493_v5   ;;  %497 = vperm.xlu1 %1348, %v491_v6   ;;  %v341_v28 = vld [vmem:[%s2175_s1 + $0x60] sm:$0xff]  ;;  %v347_v32 = vld [vmem:[%s2175_s1 + $0x90] sm:$0xff]  ;;  %v534_v33 = vld [vmem:[%s2178_s4 + $0x58] sm:$0xff] }
  0x20   : > { %1253 = vmatmul.msk.f32.vlgmr.msra.gmra.mxu1 %vm349_vm1, %v347_v32  ;;  %592 = vperm.xlu2 %1349, %v534_v33   ;;  %v345_v35 = vld [vmem:[%s2175_s1 + $0x80] sm:$0xff]  ;;  %v348_v36 = vld [vmem:[%s2175_s1 + $0x98] sm:$0xff]  ;;  %v533_v37 = vld [vmem:[%s2178_s4 + $0x50] sm:$0xff] }
  0x21   : > { %v530_v39 = vld [vmem:[%s2178_s4 + $0x38] sm:$0xff]  ;;  %v621_v48 = vld [vmem:[%s2180_s6 + $0x10] sm:$0xff]  ;;  %v1770_v55 = vld [vmem:[%s2177_s3] sm:$0xff] }
  0x22   : > { %v622_v42 = vld [vmem:[%s2180_s6 + $0x18] sm:$0xff]  ;;  %v1780_v57 = vld [vmem:[%s2177_s3 + $0x8] sm:$0xff]  ;;  %v1787_v58 = vld [vmem:[%s2177_s3 + $0x10] sm:$0xff] }
  0x23   : > { %1236 = vmatmul.msk.f32.gmra.mxu0 %vm349_vm1, %v330_v7  ;;  %v1794_v59 = vld [vmem:[%s2177_s3 + $0x18] sm:$0xff]  ;;  %v1801_v60 = vld [vmem:[%s2177_s3 + $0x20] sm:$0xff]  ;;  %v1808_v61 = vld [vmem:[%s2177_s3 + $0x28] sm:$0xff] }
  0x24   : > { %v1815_v62 = vld [vmem:[%s2177_s3 + $0x30] sm:$0xff]  ;;  %v346_v63 = vld [vmem:[%s2175_s1 + $0x88] sm:$0xff]  ;;  %v1826_v0 = vld [vmem:[%s2177_s3 + $0x38] sm:$0xff] }
  0x25   : > { %v620_v1 = vld [vmem:[%s2180_s6 + $0x8] sm:$0xff]  ;;  %v1836_v2 = vld [vmem:[%s2177_s3 + $0x40] sm:$0xff]  ;;  %v1850_v4 = vld [vmem:[%s2177_s3 + $0x50] sm:$0xff] }
  0x26   : > { %v1843_v3 = vld [vmem:[%s2177_s3 + $0x48] sm:$0xff]  ;;  %v1857_v5 = vld [vmem:[%s2177_s3 + $0x58] sm:$0xff] }
  0x27   : > { %582 = vperm.xlu0 %1347, %v532_v8   ;;  %577 = vperm.xlu1 %1348, %v531_v9  }
  0x28   : > { %1254 = vmatmul.msk.f32.gmra.mxu1 %vm349_vm1, %v348_v36  ;;  %587 = vperm.xlu2 %1349, %v533_v37  }
  0x2b   : > { %1237 = vmatmul.msk.f32.gmra.mxu0 %vm349_vm1, %v331_v10 }
  0x2f   : > { %552 = vperm.xlu0 %1347, %v526_v11   ;;  %567 = vperm.xlu1 %1348, %v529_v12  }
  0x30   : > { %572 = vperm.xlu2 %1349, %v530_v39  }
  0x33   : > { %1238 = vmatmul.msk.f32.gmra.mxu0 %vm349_vm1, %v332_v13 }
  0x37   : > { %547 = vperm.xlu0 %1347, %v525_v14   ;;  %562 = vperm.xlu1 %1348, %v528_v15  }
  0x38   : > { %640 = vperm.xlu2 %1349, %v622_v42  }
  0x3b   : > { %1239 = vmatmul.msk.f32.gmra.mxu0 %vm349_vm1, %v333_v16 }
  0x3f   : > { %542 = vperm.xlu0 %1347, %v524_v17   ;;  %557 = vperm.xlu1 %1348, %v527_v18  }
  0x40   : > { %635 = vperm.xlu2 %1349, %v621_v48  }
  0x43   : > { %1240 = vmatmul.msk.f32.gmra.mxu0 %vm349_vm1, %v334_v19 }
  0x47   : > { %537 = vperm.xlu0 %1347, %v523_v20   ;;  %625 = vperm.xlu1 %1348, %v619_v21  }
  0x48   : > { %630 = vperm.xlu2 %1349, %v620_v1   ;;  %v1921_v1 = vld [vmem:[%s2179_s5 + $0x8] sm:$0xff] }
  0x4b   : > { %1241 = vmatmul.msk.f32.gmra.mxu0 %vm349_vm1, %v335_v22 }
  0x53   : > { %1242 = vmatmul.msk.f32.gmra.mxu0 %vm349_vm1, %v336_v23 }
  0x5b   : > { %1243 = vmatmul.msk.f32.gmra.mxu0 %vm349_vm1, %v337_v24 }
  0x63   : > { %1244 = vmatmul.msk.f32.gmra.mxu0 %vm349_vm1, %v338_v25 }
  0x6b   : > { %1245 = vmatmul.msk.f32.gmra.mxu0 %vm349_vm1, %v339_v26 }
  0x73   : > { %1246 = vmatmul.msk.f32.gmra.mxu0 %vm349_vm1, %v340_v27 }
  0x7a   : > { %v593_v27 = vpop.permute.xlu2 %592 }
  0x7b   : > { %1247 = vmatmul.msk.f32.gmra.mxu0 %vm349_vm1, %v341_v28 }
  0x83   : > { %1248 = vmatmul.msk.f32.gmra.mxu0 %vm349_vm1, %v342_v29 }
  0x89   : > { %v513_v40 = vpop.permute.xlu0 %512  ;;  %v503_v43 = vpop.permute.xlu1 %502 }
  0x8b   : > { %1249 = vmatmul.msk.f32.gmra.mxu0 %vm349_vm1, %v343_v30 }
  0x91   : > { %v508_v44 = vpop.permute.xlu0 %507  ;;  %v498_v50 = vpop.permute.xlu1 %497 }
  0x93   : > { %1250 = vmatmul.msk.f32.gmra.mxu0 %vm349_vm1, %v344_v31  ;;  %v588_v31 = vpop.permute.xlu2 %587 }
  0x98   : > { %v431_v34 = vpop.f32.mrf.mxu0 }
  0x99   : > { %v515_v51 = vadd.f32 %v498_v50, %v431_v34  ;;  %v583_v33 = vpop.permute.xlu0 %582 }
  0x9b   : > { %1251 = vmatmul.msk.f32.gmra.mxu0 %vm349_vm1, %v345_v35 }
  0x9d   : > { %v1863_v7 = vpop.f32.mrf.mxu1 }
  0xa0   : > { %v434_v38 = vpop.f32.mrf.mxu0 }
  0xa1   : > { %v516_v49 = vadd.f32 %v503_v43, %v434_v38  ;;  %v578_v38 = vpop.permute.xlu1 %577 }
  0xa3   : > { %1252 = vmatmul.msk.f32.gmra.mxu0 %vm349_vm1, %v346_v63  ;;  %v1914_v63 = vld [vmem:[%s2179_s5] sm:$0xff] }
  0xa5   : > { %v1867_v9 = vpop.f32.mrf.mxu1 }
  0xa8   : > { %v437_v41 = vpop.f32.mrf.mxu0 }
  0xa9   : > { %v517_v46 = vadd.f32 %v508_v44, %v437_v41 }
  0xb0   : > { %v440_v45 = vpop.f32.mrf.mxu0 }
  0xb1   : > { %v518_v47 = vadd.f32 %v513_v40, %v440_v45 }
  0xb3   : > { %1350 = vtanh.f32 %v518_v47 }
  0xb4   : > { %1352 = vtanh.f32 %v517_v46 }
  0xb5   : > { %1354 = vtanh.f32 %v516_v49 }
  0xb6   : > { %1356 = vtanh.f32 %v515_v51 }
  0xb8   : > { %v1861_v6 = vpop.f32.mrf.mxu0 }
  0xb9   : > { %v1758_v52 = vpop.eup %1350 }
  0xba   : > { %724 = vmatpush.msrb.mxu1 %v1758_v52  ;;  %v1761_v53 = vpop.eup %1352 }
  0xbb   : > { %v1764_v54 = vpop.eup %1354 }
  0xbc   : > { %725 = vmatpush.msrb.mxu1 %v1761_v53  ;;  %v1772_v56 = vpop.eup %1356 }
  0xbe   : > { %726 = vmatpush.msrb.mxu1 %v1764_v54 }
  0xc0   : > { %727 = vmatpush.msrb.mxu1 %v1772_v56  ;;  %v1865_v8 = vpop.f32.mrf.mxu0 }
  0xc1   : > { %1255 = vmatmul.msk.f32.vlgmr.msrb.gmra.mxu1 %vm675_vm2, %v1770_v55 }
  0xc8   : > { %v1869_v10 = vpop.f32.mrf.mxu0 }
  0xc9   : > { %1256 = vmatmul.msk.f32.gmra.mxu1 %vm675_vm2, %v1780_v57 }
  0xd0   : > { %v1873_v12 = vpop.f32.mrf.mxu0 }
  0xd1   : > { %1257 = vmatmul.msk.f32.gmra.mxu1 %vm675_vm2, %v1787_v58 }
  0xd8   : > { %v1877_v14 = vpop.f32.mrf.mxu0 }
  0xd9   : > { %1258 = vmatmul.msk.f32.gmra.mxu1 %vm675_vm2, %v1794_v59 }
  0xe0   : > { %v1883_v17 = vpop.f32.mrf.mxu0 }
  0xe1   : > { %1259 = vmatmul.msk.f32.gmra.mxu1 %vm675_vm2, %v1801_v60 }
  0xe8   : > { %v1885_v19 = vpop.f32.mrf.mxu0 }
  0xe9   : > { %1260 = vmatmul.msk.f32.gmra.mxu1 %vm675_vm2, %v1808_v61 }
  0xf0   : > { %v1889_v21 = vpop.f32.mrf.mxu0 }
  0xf1   : > { %1261 = vmatmul.msk.f32.gmra.mxu1 %vm675_vm2, %v1815_v62 }
  0xf8   : > { %v467_v23 = vpop.f32.mrf.mxu0 }
  0xf9   : > { %1262 = vmatmul.msk.f32.gmra.mxu1 %vm675_vm2, %v1826_v0  ;;  %v1902_v40 = vadd.f32 %v578_v38, %v467_v23  ;;  %v1928_v23 = vld [vmem:[%s2179_s5 + $0x10] sm:$0xff] }
 0x100   : > { %v470_v26 = vpop.f32.mrf.mxu0 }
 0x101   : > { %1263 = vmatmul.msk.f32.gmra.mxu1 %vm675_vm2, %v1836_v2  ;;  %v1898_v36 = vadd.f32 %v583_v33, %v470_v26  ;;  %v553_v26 = vpop.permute.xlu0 %552 }
 0x108   : > { %v473_v29 = vpop.f32.mrf.mxu0 }
 0x109   : > { %1264 = vmatmul.msk.f32.gmra.mxu1 %vm675_vm2, %v1843_v3  ;;  %v1895_v32 = vadd.f32 %v588_v31, %v473_v29  ;;  %v573_v29 = vpop.permute.xlu2 %572 }
 0x110   : > { %v476_v34 = vpop.f32.mrf.mxu0 }
 0x111   : > { %1265 = vmatmul.msk.f32.gmra.mxu1 %vm675_vm2, %v1850_v4  ;;  %v1900_v37 = vadd.f32 %v593_v27, %v476_v34  ;;  %v568_v27 = vpop.permute.xlu1 %567  ;;  %v641_v33 = vpop.permute.xlu2 %640 }
 0x119   : > { %1266 = vmatmul.msk.f32.gmra.mxu1 %vm675_vm2, %v1857_v5 }
 0x13e   : > { %v1871_v11 = vpop.f32.mrf.mxu1 }
 0x146   : > { %v1875_v13 = vpop.f32.mrf.mxu1 }
 0x14e   : > { %v1879_v15 = vpop.f32.mrf.mxu1 }
 0x156   : > { %v1881_v16 = vpop.f32.mrf.mxu1 }
 0x15e   : > { %v741_v18 = vpop.f32.mrf.mxu1 }
 0x166   : > { %v1887_v20 = vpop.f32.mrf.mxu1 }
 0x16e   : > { %v1891_v22 = vpop.f32.mrf.mxu1 }
 0x176   : > { %v1893_v24 = vpop.f32.mrf.mxu1 }
 0x17e   : > { %v753_v25 = vpop.f32.mrf.mxu1 }
 0x17f   : > { %v773_v43 = vadd.f32 %v753_v25, %v1902_v40  ;;  %v1935_v25 = vld [vmem:[%s2179_s5 + $0x18] sm:$0xff] }
 0x186   : > { %v756_v28 = vpop.f32.mrf.mxu1 }
 0x187   : > { %v774_v41 = vadd.f32 %v756_v28, %v1898_v36  ;;  %v548_v28 = vpop.permute.xlu0 %547 }
 0x18e   : > { %v759_v30 = vpop.f32.mrf.mxu1 }
 0x18f   : > { %v775_v35 = vadd.f32 %v759_v30, %v1895_v32  ;;  %v563_v30 = vpop.permute.xlu1 %562  ;;  %v543_v31 = vpop.permute.xlu0 %542 }
 0x191   : > { %1358 = vtanh.f32 %v775_v35 }
 0x196   : > { %v762_v39 = vpop.f32.mrf.mxu1 }
 0x197   : > { %v776_v42 = vadd.f32 %v762_v39, %v1900_v37  ;;  %v1359_v44 = vpop.eup %1358  ;;  %v558_v34 = vpop.permute.xlu1 %557 }
 0x198   : > { %v799_v48 = vmul.f32 %v1359_v44, %v1761_v53  ;;  %v538_v35 = vpop.permute.xlu0 %537  ;;  %v1940_v38 = vadd.f32 %v558_v34, %v1877_v14 }
 0x199   : > { %1360 = vtanh.f32 %v776_v42  ;;  %v1943_v39 = vadd.f32 %v538_v35, %v1861_v6  ;;  %v479_v42 = vpop.f32.mrf.mxu0  ;;  %v1955_v6 = vadd.f32 %v543_v31, %v1865_v8  ;;  %v1964_v8 = vadd.f32 %v568_v27, %v1885_v19 }
 0x19a   : > { %1362 = vtanh.f32 %v774_v41  ;;  %v769_v41 = vadd.f32 %v741_v18, %v1940_v38 }
 0x19b   : > { %1364 = vtanh.f32 %v773_v43  ;;  %v636_v43 = vpop.permute.xlu2 %635  ;;  %v765_v44 = vadd.f32 %v1871_v11, %v1943_v39 }
 0x19c   : > { %1366 = vtanh.f32 %v769_v41 }
 0x19d   : > { %1368 = vtanh.f32 %v765_v44  ;;  %v1969_v44 = vadd.f32 %v548_v28, %v1869_v10 }
 0x19f   : > { %v1361_v45 = vpop.eup %1360  ;;  %v767_v19 = vadd.f32 %v1879_v15, %v1969_v44 }
 0x1a0   : > { %v800_v46 = vmul.f32 %v1361_v45, %v1758_v52  ;;  %v1363_v47 = vpop.eup %1362  ;;  %v626_v45 = vpop.permute.xlu1 %625 }
 0x1a1   : > { %v1365_v49 = vpop.eup %1364  ;;  %v798_v50 = vmul.f32 %v1363_v47, %v1764_v54  ;;  %v482_v11 = vpop.f32.mrf.mxu0 }
 0x1a2   : > { %825 = vmatpush.msra.mxu3 %v800_v46  ;;  %v797_v51 = vmul.f32 %v1365_v49, %v1772_v56  ;;  %v1948_v46 = vadd.f32 %v626_v45, %v479_v42 }
 0x1a3   : > { %v631_v49 = vpop.permute.xlu2 %630 }
 0x1a4   : > { %826 = vmatpush.msra.mxu3 %v799_v48  ;;  %v1951_v48 = vadd.f32 %v563_v30, %v1883_v17  ;;  %v1961_v17 = vadd.f32 %v631_v49, %v482_v11 }
 0x1a6   : > { %827 = vmatpush.msra.mxu3 %v798_v50  ;;  %v770_v18 = vadd.f32 %v1887_v20, %v1951_v48  ;;  %v1367_v50 = vpop.eup %1366 }
 0x1a7   : > { %v1369_v34 = vpop.eup %1368  ;;  %v850_v30 = vsub.f32 1.0, %v1367_v50  ;;  %v1986_v50 = vadd.f32 %v553_v26, %v1873_v12 }
 0x1a8   : > { %828 = vmatpush.msra.mxu3 %v797_v51  ;;  %v766_v51 = vadd.f32 %v1875_v13, %v1955_v6  ;;  %v858_v42 = vmul.f32 %v1369_v34, %v1772_v56  ;;  %v771_v13 = vadd.f32 %v1891_v22, %v1964_v8 }
 0x1a9   : > { %1267 = vmatmul.msk.f32.vlgmr.msra.gmra.mxu3 %vm675_vm2, %v1914_v63 }
 0x1b1   : > { %1268 = vmatmul.msk.f32.gmra.mxu3 %vm675_vm2, %v1921_v1 }
 0x1b9   : > { %1269 = vmatmul.msk.f32.gmra.mxu3 %vm675_vm2, %v1928_v23 }
 0x1c1   : > { %1270 = vmatmul.msk.f32.gmra.mxu3 %vm675_vm2, %v1935_v25 }
 0x22c   : > { %v830_v47 = vpop.f32.mrf.mxu3 }
 0x22d   : > { %v842_v14 = vadd.f32 %v830_v47, %v1948_v46 }
 0x22f   : > { %1370 = vtanh.f32 %v842_v14  ;;  %v1978_v14 = vadd.f32 %v573_v29, %v1889_v21  ;;  %v768_v29 = vadd.f32 %v1881_v16, %v1986_v50 }
 0x230   : > { %1372 = vtanh.f32 %v770_v18  ;;  %v1981_v18 = vadd.f32 %v636_v43, %v1863_v7 }
 0x231   : > { %1374 = vtanh.f32 %v766_v51  ;;  %v772_v15 = vadd.f32 %v1893_v24, %v1978_v14  ;;  %v1995_v51 = vadd.f32 %v641_v33, %v1867_v9 }
 0x234   : > { %v833_v35 = vpop.f32.mrf.mxu3 }
 0x235   : > { %v1371_v41 = vpop.eup %1370  ;;  %v843_v20 = vadd.f32 %v833_v35, %v1961_v17 }
 0x236   : > { %v854_v31 = vmul.f32 %v1371_v41, %v850_v30  ;;  %v1373_v47 = vpop.eup %1372 }
 0x237   : > { %1376 = vtanh.f32 %v843_v20  ;;  %v1375_v27 = vpop.eup %1374  ;;  %v851_v56 = vsub.f32 1.0, %v1373_v47 }
 0x238   : > { %v1973_v45 = vadd.f32 %v858_v42, %v854_v31  ;;  %1378 = vtanh.f32 %v771_v13  ;;  %v859_v11 = vmul.f32 %v1375_v27, %v1764_v54 }
 0x239   : > { %1380 = vtanh.f32 %v767_v19 }
 0x23c   : > { %v836_v10 = vpop.f32.mrf.mxu3 }
 0x23d   : > { %v1377_v28 = vpop.eup %1376  ;;  %v844_v22 = vadd.f32 %v836_v10, %v1981_v18 }
 0x23e   : > { %v855_v49 = vmul.f32 %v1377_v28, %v851_v56  ;;  %v1379_v7 = vpop.eup %1378 }
 0x23f   : > { %1382 = vtanh.f32 %v844_v22  ;;  %v1381_v43 = vpop.eup %1380  ;;  %v852_v34 = vsub.f32 1.0, %v1379_v7 }
 0x240   : > { %v1990_v21 = vadd.f32 %v859_v11, %v855_v49  ;;  %1384 = vtanh.f32 %v772_v15  ;;  %v860_v24 = vmul.f32 %v1381_v43, %v1761_v53 }
 0x241   : > { %1386 = vtanh.f32 %v768_v29 }
 0x244   : > { %v839_v54 = vpop.f32.mrf.mxu3 }
 0x245   : > { %v1383_v30 = vpop.eup %1382  ;;  %v845_v12 = vadd.f32 %v839_v54, %v1995_v51 }
 0x246   : > { %v856_v26 = vmul.f32 %v1383_v30, %v852_v34  ;;  %v1385_v41 = vpop.eup %1384 }
 0x247   : > { %1388 = vtanh.f32 %v845_v12  ;;  %v1387_v20 = vpop.eup %1386  ;;  %v853_v16 = vsub.f32 1.0, %v1385_v41 }
 0x248   : > { %v1999_v35 = vadd.f32 %v860_v24, %v856_v26  ;;  %v861_v9 = vmul.f32 %v1387_v20, %v1758_v52 }
 0x24d   : > { %v1389_v31 = vpop.eup %1388 }
 0x24e   : > { %v857_v42 = vmul.f32 %v1389_v31, %v853_v16 }
 0x250   : > { %v2002_v33 = vadd.f32 %v861_v9, %v857_v42 }
 0x252   : > { %878 = vmatpush.msrb.mxu3 %v2002_v33 }
 0x254   : > { %879 = vmatpush.msrb.mxu3 %v1999_v35 }
 0x256   : > { %880 = vmatpush.msrb.mxu3 %v1990_v21 }
 0x258   : > { %881 = vmatpush.msrb.mxu3 %v1973_v45 }
 0x259   : > { %1271 = vmatmul.msk.f32.vlgmr.msrb.gmra.mxu3 %vm675_vm2, %v1770_v55 }
 0x261   : > { %1272 = vmatmul.msk.f32.gmra.mxu3 %vm675_vm2, %v1780_v57 }
 0x269   : > { %1273 = vmatmul.msk.f32.gmra.mxu3 %vm675_vm2, %v1787_v58 }
 0x271   : > { %1274 = vmatmul.msk.f32.gmra.mxu3 %vm675_vm2, %v1794_v59 }
 0x279   : > { %1275 = vmatmul.msk.f32.gmra.mxu3 %vm675_vm2, %v1801_v60 }
 0x281   : > { %1276 = vmatmul.msk.f32.gmra.mxu3 %vm675_vm2, %v1808_v61 }
 0x289   : > { %1277 = vmatmul.msk.f32.gmra.mxu3 %vm675_vm2, %v1815_v62 }
 0x291   : > { %1278 = vmatmul.msk.f32.gmra.mxu3 %vm675_vm2, %v1826_v0 }
 0x299   : > { %1279 = vmatmul.msk.f32.gmra.mxu3 %vm675_vm2, %v1836_v2 }
 0x2a1   : > { %1280 = vmatmul.msk.f32.gmra.mxu3 %vm675_vm2, %v1843_v3 }
 0x2a9   : > { %1281 = vmatmul.msk.f32.gmra.mxu3 %vm675_vm2, %v1850_v4 }
 0x2b1   : > { %1282 = vmatmul.msk.f32.gmra.mxu3 %vm675_vm2, %v1857_v5 }
 0x2dc   : > { %v883_v52 = vpop.f32.mrf.mxu3 }
 0x2dd   : > { %v919_v31 = vadd.f32 %v883_v52, %v1943_v39 }
 0x2e4   : > { %v886_v53 = vpop.f32.mrf.mxu3 }
 0x2ec   : > { %v889_v13 = vpop.f32.mrf.mxu3 }
 0x2f4   : > { %v2032_v47 = vpop.f32.mrf.mxu3 }
 0x2fc   : > { %v895_v19 = vpop.f32.mrf.mxu3 }
 0x2fd   : > { %v923_v16 = vadd.f32 %v895_v19, %v1940_v38 }
 0x304   : > { %v898_v27 = vpop.f32.mrf.mxu3 }
 0x30c   : > { %v901_v56 = vpop.f32.mrf.mxu3 }
 0x314   : > { %v904_v10 = vpop.f32.mrf.mxu3 }
 0x31c   : > { %v907_v28 = vpop.f32.mrf.mxu3 }
 0x31d   : > { %v927_v43 = vadd.f32 %v907_v28, %v1902_v40  ;;  %v924_v28 = vadd.f32 %v898_v27, %v1951_v48 }
 0x324   : > { %v910_v22 = vpop.f32.mrf.mxu3 }
 0x325   : > { %v928_v7 = vadd.f32 %v910_v22, %v1898_v36 }
 0x32c   : > { %v913_v49 = vpop.f32.mrf.mxu3 }
 0x32d   : > { %v929_v11 = vadd.f32 %v913_v49, %v1895_v32  ;;  %v920_v49 = vadd.f32 %v886_v53, %v1955_v6 }
 0x32f   : > { %1390 = vtanh.f32 %v929_v11 }
 0x334   : > { %v916_v15 = vpop.f32.mrf.mxu3 }
 0x335   : > { %v930_v29 = vadd.f32 %v916_v15, %v1900_v37  ;;  %v1391_v34 = vpop.eup %1390 }
 0x336   : > { %v945_v26 = vmul.f32 %v1391_v34, %v1999_v35  ;;  %v925_v34 = vadd.f32 %v901_v56, %v1964_v8 }
 0x337   : > { %1392 = vtanh.f32 %v930_v29 }
 0x338   : > { %1394 = vtanh.f32 %v928_v7 }
 0x339   : > { %1396 = vtanh.f32 %v927_v43 }
 0x33a   : > { %1398 = vtanh.f32 %v923_v16 }
 0x33b   : > { %1400 = vtanh.f32 %v919_v31 }
 0x33d   : > { %v1393_v54 = vpop.eup %1392 }
 0x33e   : > { %v946_v30 = vmul.f32 %v1393_v54, %v2002_v33  ;;  %v1395_v12 = vpop.eup %1394 }
 0x33f   : > { %v1397_v24 = vpop.eup %1396  ;;  %v944_v41 = vmul.f32 %v1395_v12, %v1990_v21 }
 0x340   : > { %959 = vmatpush.msra.mxu2 %v946_v30  ;;  %v943_v20 = vmul.f32 %v1397_v24, %v1973_v45  ;;  %v1399_v22 = vpop.eup %1398  ;;  %v921_v30 = vadd.f32 %v889_v13, %v1969_v44  ;;  %v922_v13 = vadd.f32 %v2032_v47, %v1986_v50 }
 0x341   : > { %v1401_v11 = vpop.eup %1400  ;;  %v984_v15 = vsub.f32 1.0, %v1399_v22 }
 0x342   : > { %960 = vmatpush.msra.mxu2 %v945_v26  ;;  %v992_v43 = vmul.f32 %v1401_v11, %v1973_v45  ;;  %v926_v45 = vadd.f32 %v904_v10, %v1978_v14 }
 0x344   : > { %961 = vmatpush.msra.mxu2 %v944_v41 }
 0x346   : > { %962 = vmatpush.msra.mxu2 %v943_v20 }
 0x347   : > { %1283 = vmatmul.msk.f32.vlgmr.msra.gmra.mxu2 %vm675_vm2, %v1914_v63 }
 0x34f   : > { %1284 = vmatmul.msk.f32.gmra.mxu2 %vm675_vm2, %v1921_v1 }
 0x357   : > { %1285 = vmatmul.msk.f32.gmra.mxu2 %vm675_vm2, %v1928_v23 }
 0x35f   : > { %1286 = vmatmul.msk.f32.gmra.mxu2 %vm675_vm2, %v1935_v25 }
 0x3ca   : > { %v964_v42 = vpop.f32.mrf.mxu2 }
 0x3cb   : > { %v976_v9 = vadd.f32 %v964_v42, %v1948_v46 }
 0x3cd   : > { %1402 = vtanh.f32 %v976_v9 }
 0x3ce   : > { %1404 = vtanh.f32 %v924_v28 }
 0x3cf   : > { %1406 = vtanh.f32 %v920_v49 }
 0x3d2   : > { %v967_v7 = vpop.f32.mrf.mxu2 }
 0x3d3   : > { %v1403_v29 = vpop.eup %1402  ;;  %v977_v19 = vadd.f32 %v967_v7, %v1961_v17 }
 0x3d4   : > { %v988_v52 = vmul.f32 %v1403_v29, %v984_v15  ;;  %v1405_v27 = vpop.eup %1404 }
 0x3d5   : > { %1408 = vtanh.f32 %v977_v19  ;;  %v1407_v53 = vpop.eup %1406  ;;  %v985_v12 = vsub.f32 1.0, %v1405_v27 }
 0x3d6   : > { %v2058_v54 = vadd.f32 %v992_v43, %v988_v52  ;;  %1410 = vtanh.f32 %v925_v34  ;;  %v993_v16 = vmul.f32 %v1407_v53, %v1990_v21 }
 0x3d7   : > { %1412 = vtanh.f32 %v921_v30 }
 0x3da   : > { %v970_v26 = vpop.f32.mrf.mxu2 }
 0x3db   : > { %v1409_v24 = vpop.eup %1408  ;;  %v978_v41 = vadd.f32 %v970_v26, %v1981_v18 }
 0x3dc   : > { %v989_v20 = vmul.f32 %v1409_v24, %v985_v12  ;;  %v1411_v31 = vpop.eup %1410 }
 0x3dd   : > { %1414 = vtanh.f32 %v978_v41  ;;  %v1413_v42 = vpop.eup %1412  ;;  %v986_v9 = vsub.f32 1.0, %v1411_v31 }
 0x3de   : > { %v2064_v56 = vadd.f32 %v993_v16, %v989_v20  ;;  %1416 = vtanh.f32 %v926_v45  ;;  %v994_v21 = vmul.f32 %v1413_v42, %v1999_v35 }
 0x3df   : > { %1418 = vtanh.f32 %v922_v13 }
 0x3e2   : > { %v973_v28 = vpop.f32.mrf.mxu2 }
 0x3e3   : > { %v1415_v22 = vpop.eup %1414  ;;  %v979_v49 = vadd.f32 %v973_v28, %v1995_v51 }
 0x3e4   : > { %v990_v11 = vmul.f32 %v1415_v22, %v986_v9  ;;  %v1417_v15 = vpop.eup %1416 }
 0x3e5   : > { %1420 = vtanh.f32 %v979_v49  ;;  %v1419_v7 = vpop.eup %1418  ;;  %v987_v29 = vsub.f32 1.0, %v1417_v15 }
 0x3e6   : > { %v2070_v10 = vadd.f32 %v994_v21, %v990_v11  ;;  %v995_v47 = vmul.f32 %v1419_v7, %v2002_v33 }
 0x3eb   : > { %v1421_v19 = vpop.eup %1420 }
 0x3ec   : > { %v991_v52 = vmul.f32 %v1421_v19, %v987_v29 }
 0x3ee   : > { %v2073_v43 = vadd.f32 %v995_v47, %v991_v52 }
 0x3f0   : > { %1012 = vmatpush.msrb.mxu2 %v2073_v43 }
 0x3f2   : > { %1013 = vmatpush.msrb.mxu2 %v2070_v10 }
 0x3f4   : > { %1014 = vmatpush.msrb.mxu2 %v2064_v56 }
 0x3f6   : > { %1015 = vmatpush.msrb.mxu2 %v2058_v54 }
 0x3f7   : > { %1287 = vmatmul.msk.f32.vlgmr.msrb.gmra.mxu2 %vm675_vm2, %v1770_v55 }
 0x3ff   : > { %1288 = vmatmul.msk.f32.gmra.mxu2 %vm675_vm2, %v1780_v57 }
 0x407   : > { %1289 = vmatmul.msk.f32.gmra.mxu2 %vm675_vm2, %v1787_v58 }
 0x40f   : > { %1290 = vmatmul.msk.f32.gmra.mxu2 %vm675_vm2, %v1794_v59 }
 0x417   : > { %1291 = vmatmul.msk.f32.gmra.mxu2 %vm675_vm2, %v1801_v60 }
 0x41f   : > { %1292 = vmatmul.msk.f32.gmra.mxu2 %vm675_vm2, %v1808_v61 }
 0x427   : > { %1293 = vmatmul.msk.f32.gmra.mxu2 %vm675_vm2, %v1815_v62 }
 0x42f   : > { %1294 = vmatmul.msk.f32.gmra.mxu2 %vm675_vm2, %v1826_v0 }
 0x437   : > { %1295 = vmatmul.msk.f32.gmra.mxu2 %vm675_vm2, %v1836_v2 }
 0x43f   : > { %1296 = vmatmul.msk.f32.gmra.mxu2 %vm675_vm2, %v1843_v3 }
 0x447   : > { %1297 = vmatmul.msk.f32.gmra.mxu2 %vm675_vm2, %v1850_v4 }
 0x44f   : > { %1298 = vmatmul.msk.f32.gmra.mxu2 %vm675_vm2, %v1857_v5 }
 0x47a   : > { %v1017_v55 = vpop.f32.mrf.mxu2 }
 0x47b   : > { %v1053_v41 = vadd.f32 %v1017_v55, %v1943_v39 }
 0x482   : > { %v1020_v57 = vpop.f32.mrf.mxu2 }
 0x48a   : > { %v1023_v58 = vpop.f32.mrf.mxu2 }
 0x48b   : > { %v1055_v28 = vadd.f32 %v1023_v58, %v1969_v44 }
 0x492   : > { %v2103_v59 = vpop.f32.mrf.mxu2 }
 0x493   : > { %v1056_v29 = vadd.f32 %v2103_v59, %v1986_v50 }
 0x49a   : > { %v1029_v60 = vpop.f32.mrf.mxu2 }
 0x4a2   : > { %v1032_v61 = vpop.f32.mrf.mxu2 }
 0x4aa   : > { %v1035_v62 = vpop.f32.mrf.mxu2 }
 0x4ab   : > { %v1059_v9 = vadd.f32 %v1035_v62, %v1964_v8 }
 0x4b2   : > { %v1038_v0 = vpop.f32.mrf.mxu2 }
 0x4ba   : > { %v1041_v35 = vpop.f32.mrf.mxu2 }
 0x4bb   : > { %v1061_v5 = vadd.f32 %v1041_v35, %v1902_v40  ;;  %v1057_v40 = vadd.f32 %v1029_v60, %v1940_v38 }
 0x4c2   : > { %v1044_v2 = vpop.f32.mrf.mxu2 }
 0x4c3   : > { %v1062_v4 = vadd.f32 %v1044_v2, %v1898_v36 }
 0x4ca   : > { %v1047_v33 = vpop.f32.mrf.mxu2 }
 0x4cb   : > { %v1063_v3 = vadd.f32 %v1047_v33, %v1895_v32 }
 0x4cd   : > { %1422 = vtanh.f32 %v1063_v3 }
 0x4d2   : > { %v1050_v34 = vpop.f32.mrf.mxu2 }
 0x4d3   : > { %v1064_v27 = vadd.f32 %v1050_v34, %v1900_v37  ;;  %v1423_v30 = vpop.eup %1422 }
 0x4d4   : > { %v1079_v24 = vmul.f32 %v1423_v30, %v2070_v10 }
 0x4d5   : > { %1424 = vtanh.f32 %v1064_v27 }
 0x4d6   : > { %1426 = vtanh.f32 %v1062_v4 }
 0x4d7   : > { %1428 = vtanh.f32 %v1061_v5 }
 0x4d8   : > { %1430 = vtanh.f32 %v1057_v40 }
 0x4d9   : > { %1432 = vtanh.f32 %v1053_v41 }
 0x4db   : > { %v1425_v53 = vpop.eup %1424 }
 0x4dc   : > { %v1080_v12 = vmul.f32 %v1425_v53, %v2073_v43  ;;  %v1427_v26 = vpop.eup %1426 }
 0x4dd   : > { %v1429_v32 = vpop.eup %1428  ;;  %v1078_v36 = vmul.f32 %v1427_v26, %v2064_v56 }
 0x4de   : > { %1093 = vmatpush.msra.mxu1 %v1080_v12  ;;  %v1077_v37 = vmul.f32 %v1429_v32, %v2058_v54  ;;  %v1431_v45 = vpop.eup %1430 }
 0x4df   : > { %v1433_v31 = vpop.eup %1432 }
 0x4e0   : > { %1094 = vmatpush.msra.mxu1 %v1079_v24  ;;  %v1126_v42 = vmul.f32 %v1433_v31, %v2058_v54  ;;  %v1060_v54 = vadd.f32 %v1038_v0, %v1978_v14 }
 0x4e2   : > { %1095 = vmatpush.msra.mxu1 %v1078_v36 }
 0x4e4   : > { %1096 = vmatpush.msra.mxu1 %v1077_v37 }
 0x4e5   : > { %1299 = vmatmul.msk.f32.vlgmr.msra.gmra.mxu1 %vm675_vm2, %v1914_v63  ;;  %v1058_v63 = vadd.f32 %v1032_v61, %v1951_v48 }
 0x4ed   : > { %1300 = vmatmul.msk.f32.gmra.mxu1 %vm675_vm2, %v1921_v1  ;;  %v1054_v1 = vadd.f32 %v1020_v57, %v1955_v6 }
 0x4f5   : > { %1301 = vmatmul.msk.f32.gmra.mxu1 %vm675_vm2, %v1928_v23  ;;  %v1118_v23 = vsub.f32 1.0, %v1431_v45 }
 0x4fd   : > { %1302 = vmatmul.msk.f32.gmra.mxu1 %vm675_vm2, %v1935_v25 }
 0x562   : > { %v1098_v20 = vpop.f32.mrf.mxu1 }
 0x563   : > { %v1110_v16 = vadd.f32 %v1098_v20, %v1948_v46 }
 0x565   : > { %1434 = vtanh.f32 %v1110_v16 }
 0x566   : > { %1436 = vtanh.f32 %v1058_v63 }
 0x567   : > { %1438 = vtanh.f32 %v1054_v1 }
 0x56a   : > { %v1101_v13 = vpop.f32.mrf.mxu1 }
 0x56b   : > { %v1435_v25 = vpop.eup %1434  ;;  %v1111_v38 = vadd.f32 %v1101_v13, %v1961_v17 }
 0x56c   : > { %v1122_v39 = vmul.f32 %v1435_v25, %v1118_v23  ;;  %v1437_v48 = vpop.eup %1436 }
 0x56d   : > { %1440 = vtanh.f32 %v1111_v38  ;;  %v1439_v22 = vpop.eup %1438  ;;  %v1119_v6 = vsub.f32 1.0, %v1437_v48 }
 0x56e   : > { %v1130_v46 = vadd.f32 %v1126_v42, %v1122_v39  ;;  %1442 = vtanh.f32 %v1059_v9  ;;  %v1127_v17 = vmul.f32 %v1439_v22, %v2064_v56 }
 0x56f   : > { %1444 = vtanh.f32 %v1055_v28 }
 0x572   : > { %v1104_v49 = vpop.f32.mrf.mxu1 }
 0x573   : > { %v1441_v11 = vpop.eup %1440  ;;  %v1112_v21 = vadd.f32 %v1104_v49, %v1981_v18 }
 0x574   : > { %v1123_v15 = vmul.f32 %v1441_v11, %v1119_v6  ;;  %v1443_v7 = vpop.eup %1442 }
 0x575   : > { %1446 = vtanh.f32 %v1112_v21  ;;  %v1445_v44 = vpop.eup %1444  ;;  %v1120_v19 = vsub.f32 1.0, %v1443_v7 }
 0x576   : > { %v1131_v8 = vadd.f32 %v1127_v17, %v1123_v15  ;;  %1448 = vtanh.f32 %v1060_v54  ;;  %v1128_v57 = vmul.f32 %v1445_v44, %v2070_v10  ;;  %v1136_v10 = vstv %s1135_s24 }
 0x577   : > { %1450 = vtanh.f32 %v1056_v29 }
 0x57a   : > { %v1107_v52 = vpop.f32.mrf.mxu1 }
 0x57b   : > { %v1447_v47 = vpop.eup %1446  ;;  %v1113_v55 = vadd.f32 %v1107_v52, %v1995_v51  ;;  %v1134_v51 = vld [vmem:[%s2181_s7] sm:$0x1] }
 0x57c   : > { %v1124_v18 = vmul.f32 %v1447_v47, %v1120_v19  ;;  %v1449_v56 = vpop.eup %1448 }
 0x57d   : > { %1452 = vtanh.f32 %v1113_v55  ;;  %v1451_v58 = vpop.eup %1450  ;;  %v1121_v60 = vsub.f32 1.0, %v1449_v56 }
 0x57e   : > { %v1132_v14 = vadd.f32 %v1128_v57, %v1124_v18  ;;  %v1129_v50 = vmul.f32 %v1451_v58, %v2073_v43 }
 0x583   : > { %v1453_v61 = vpop.eup %1452 }
 0x584   : > { %v1125_v59 = vmul.f32 %v1453_v61, %v1121_v60 }
 0x586   : > { %v1133_v62 = vadd.f32 %v1129_v50, %v1125_v59 }
 0x588   : > { %1152 = vmatpush.msra.mxu3 %v1133_v62 }
 0x58a   : > { %1153 = vmatpush.msra.mxu3 %v1132_v14 }
 0x58c   : > { %1154 = vmatpush.msra.mxu3 %v1131_v8 }
 0x58e   : > { %1155 = vmatpush.msra.mxu3 %v1130_v46 }
 0x58f   : > { %1303 = vmatmul.msk.f32.vlgmr.msra.gmra.mxu3 %vm675_vm2, %v1134_v51 }
 0x612   : > { %v1157_v43 = vpop.f32.mrf.mxu3 }
 0x613   : > { %v1158_v0 = vadd.f32 %v1157_v43, %v1136_v10 }
 0x615   : > { %1160 = vst [vmem:[%s323_s29] sm:$0x1] %v1158_v0 }
 0x616   : > { %1481 = shalt.err (!%p1478_p3)
}
 0x617   : > { %1307 = dma.vmem_to_hbm [thread:$0]  (%p1610_p5), %s1173_s30, 16, %s1175_s10, %s1162_s15  }
 0x618 PF: > { %p1313_p4 = scmp.ge.s32.totalorder %s1516_s14, 2  ;;  %s1186_s25 = sand.u32 1, %s1504_s11  }
 0x619   : > { %s1187_s27 = scalar_lea.sflag [#allocation6], %s1186_s25 }
 0x61a   : > { %p1310_p7 = pnand %p1313_p4, %p1614_p6 }
 0x61c   : > { %p1311_p8 = pneg %p1310_p7 }
 0x61e   : > { %1499 = dma.done.wait (%p1311_p8), %s1187_s27, 16  }
 0x61f   : > { %1501 = vsyncadd (%p1311_p8), %s1187_s27, 4294967280  ;;  %p20_p9 = scmp.ge.s32.totalorder %s1597_s16, 4   ;;  %s2186_s11 = smov %s1508_s12 }
 0x620   : > { %s2187_s12 = smov %s1512_s13  ;;  %s2188_s13 = smov %s1608_s19 }
 0x621   : > { %s2189_s14 = smov %s1597_s16  ;;  %22 = sbr.rel (!%p20_p9) target bundleno = 5 (0x5), region = 91 }
 0x626   :  { %1192 = vsyncpa [#allocation6], 1 }
 0x627   :  { %1194 = vsyncpa [#allocation6 + $0x1], 1 }

</bundles_post_ra>
